<compile_context>
chip_gen: v7x
topology: tpu7x:2x2x1
jax: 0.10.0
libtpu: 0.0.40
codegen_flags: <defaults>
</compile_context>

<pallas_src>
import functools

import jax
import jax.numpy as jnp
from jax.experimental import pallas as pl
from jax.experimental.pallas import tpu as pltpu


# ----------------------------- Pallas kernels ----------------------------- #

def _conv_bias_relu_kernel(x_ref, w_ref, b_ref, o_ref):
    """relu(patches_tile @ W_strip + bias) — conv1 (BN scale pre-folded)."""
    acc = jnp.dot(x_ref[...], w_ref[...], preferred_element_type=jnp.float32)
    o_ref[...] = jnp.maximum(acc + b_ref[...], 0.0).astype(o_ref.dtype)


def _conv_bias_add_relu_kernel(x_ref, w_ref, b_ref, r_ref, o_ref):
    """conv2 with identity shortcut: relu(patches @ W + bias + residual)."""
    acc = jnp.dot(x_ref[...], w_ref[...], preferred_element_type=jnp.float32)
    acc = acc + b_ref[...] + r_ref[...].astype(jnp.float32)
    o_ref[...] = jnp.maximum(acc, 0.0).astype(o_ref.dtype)


def _conv_proj_bias_relu_kernel(x_ref, w_ref, b_ref, xs_ref, ws_ref, o_ref):
    """conv2 with fused 1x1 projection shortcut:
       relu(patches @ W + xs @ Ws + bias)   (both scales pre-folded)."""
    acc = jnp.dot(x_ref[...], w_ref[...], preferred_element_type=jnp.float32)
    acc += jnp.dot(xs_ref[...], ws_ref[...], preferred_element_type=jnp.float32)
    o_ref[...] = jnp.maximum(acc + b_ref[...], 0.0).astype(o_ref.dtype)


# ------------------------------- helpers ----------------------------------- #

def _cdiv(a, b):
    return -(-a // b)


def _round_up(x, m):
    return (x + m - 1) // m * m


def _pad2(a, rows, cols):
    pr, pc = rows - a.shape[0], cols - a.shape[1]
    if pr == 0 and pc == 0:
        return a
    return jnp.pad(a, ((0, pr), (0, pc)))


@functools.lru_cache(maxsize=1)
def _device_cfg():
    """Generation-specific tile maxima and scoped-VMEM budget."""
    try:
        kind = jax.devices()[0].device_kind.lower()
    except Exception:  # pragma: no cover
        kind = ""
    if "v7" in kind:      # 64 MiB VMEM, 2 TCs -> smaller tiles, capped budget
        return {"tm_max": 256, "tn_max": 256, "vmem": 44 * 2 ** 20}
    if "v6" in kind:      # 128 MiB VMEM, 256-wide MXU -> big tiles
        return {"tm_max": 512, "tn_max": 512, "vmem": 96 * 2 ** 20}
    if "v5" in kind:      # v5e: HBM-bound, 128-wide MXU -> grow M, keep tn<=256
        return {"tm_max": 512, "tn_max": 256, "vmem": 64 * 2 ** 20}
    return {"tm_max": 256, "tn_max": 256, "vmem": 32 * 2 ** 20}


def _pick_tn(Np, tn_max):
    """Largest multiple of 128 that is <= tn_max and divides Np."""
    t = max(128, (min(tn_max, Np) // 128) * 128)
    while Np % t:
        t -= 128
    return t


def _pick_tm(M, tm_max):
    """Balanced M tile; always >= 2 M tiles when possible (megacore / v7x)."""
    Mp8 = _round_up(M, 8)
    ntiles = max(2, _cdiv(Mp8, tm_max)) if Mp8 > 8 else 1
    return _round_up(_cdiv(Mp8, ntiles), 8)


def _shrink_to_fit(tm, tn, Kp, Ksp, vmem_limit):
    """Keep the double-buffered footprint inside the scoped-VMEM budget."""
    def footprint(tm_):
        b = 2 * (tm_ * Kp + Kp * tn) * 2        # bf16 A tile + B strip, x2 bufs
        b += 2 * (tm_ * Ksp + Ksp * tn) * 2     # shortcut operands (if any)
        b += 2 * tm_ * tn * 4                   # f32 output tiles
        b += 2 * tm_ * tn * 2                   # bf16 residual tiles (if any)
        b += 2 * 8 * tn * 4                     # bias rows
        return b
    while footprint(tm) > 0.8 * vmem_limit and tm > 8:
        tm = _round_up(tm // 2, 8)
    return tm


# ------------------------------ conv wrapper -------------------------------- #

def _conv_matmul(patches, w_folded, bias, *, shortcut=None, residual=None,
                 out_dtype=jnp.float32):
    """relu(patches @ w_folded + bias [+ xs @ ws_folded] [+ residual])
    as one Pallas call.

    patches : (M, K)  bf16-castable im2col matrix.
    w_folded: (K, N)  f32 weights with BN scale already folded in.
    bias    : (N,)    f32 folded BN bias (beta - mean*scale).
    shortcut: (xs:(M, Ks), ws_folded:(Ks, N)) fused 1x1 projection, or None.
    residual: (M, N) identity-shortcut tensor added before ReLU, or None.
    """
    assert shortcut is None or residual is None
    M, K = patches.shape
    N = w_folded.shape[1]
    cfg = _device_cfg()

    # Pad K/N only to the 128-lane tile; pick tiles per generation.
    Kp, Np = _round_up(K, 128), _round_up(N, 128)
    tn = _pick_tn(Np, cfg["tn_max"])
    tm = _pick_tm(M, cfg["tm_max"])
    Ksp = _round_up(shortcut[0].shape[1], 128) if shortcut is not None else 0
    tm = _shrink_to_fit(tm, tn, Kp, Ksp, cfg["vmem"])
    Mp = _round_up(M, tm)

    xp = _pad2(patches.astype(jnp.bfloat16), Mp, Kp)
    wp = _pad2(w_folded.astype(jnp.bfloat16), Kp, Np)
    bp = _pad2(bias.reshape(1, N).astype(jnp.float32), 1, Np)

    # Grid: N tiles outermost so each full-K weight strip (Kp, tn) is DMA'd
    # once per j and stays VMEM-resident while the M tiles stream past it.
    grid = (Np // tn, Mp // tm)
    in_specs = [
        pl.BlockSpec((tm, Kp), lambda j, i: (i, 0)),   # patches tile, full K
        pl.BlockSpec((Kp, tn), lambda j, i: (0, j)),   # resident weight strip
        pl.BlockSpec((1, tn), lambda j, i: (0, j)),    # folded bias row
    ]
    args = [xp, wp, bp]

    if shortcut is not None:
        xs, ws = shortcut
        args += [_pad2(xs.astype(jnp.bfloat16), Mp, Ksp),
                 _pad2(ws.astype(jnp.bfloat16), Ksp, Np)]
        in_specs += [pl.BlockSpec((tm, Ksp), lambda j, i: (i, 0)),
                     pl.BlockSpec((Ksp, tn), lambda j, i: (0, j))]
        kernel = _conv_proj_bias_relu_kernel
    elif residual is not None:
        args += [_pad2(residual.astype(jnp.bfloat16), Mp, Np)]
        in_specs += [pl.BlockSpec((tm, tn), lambda j, i: (i, j))]
        kernel = _conv_bias_add_relu_kernel
    else:
        kernel = _conv_bias_relu_kernel

    out = pl.pallas_call(
        kernel,
        out_shape=jax.ShapeDtypeStruct((Mp, Np), out_dtype),
        grid_spec=pltpu.PrefetchScalarGridSpec(
            num_scalar_prefetch=0,
            grid=grid,
            in_specs=in_specs,
            out_specs=pl.BlockSpec((tm, tn), lambda j, i: (i, j)),
        ),
        compiler_params=pltpu.CompilerParams(
            dimension_semantics=("parallel", "parallel"),
            vmem_limit_bytes=cfg["vmem"],
        ),
    )(*args)
    return out[:M, :N]


def _im2col(x_nhwc, ksize, stride, pad):
    """Unfold NHWC input to (N*Ho*Wo, k*k*C) patches (plain-JAX glue, bf16).
    # TODO(synk): fold into the kernel (manual DMA of shifted row slabs)."""
    N, H, W, C = x_nhwc.shape
    Ho = (H + 2 * pad - ksize) // stride + 1
    Wo = (W + 2 * pad - ksize) // stride + 1
    xp = jnp.pad(x_nhwc, ((0, 0), (pad, pad), (pad, pad), (0, 0)))
    cols = []
    for dy in range(ksize):
        for dx in range(ksize):
            cols.append(xp[:, dy: dy + stride * (Ho - 1) + 1: stride,
                              dx: dx + stride * (Wo - 1) + 1: stride, :])
    patches = jnp.stack(cols, axis=3)            # (N, Ho, Wo, k*k, C)
    return patches.reshape(N * Ho * Wo, ksize * ksize * C), Ho, Wo


# ------------------------------ BasicBlock ---------------------------------- #

def basic_block_forward(x_nchw, params, stride):
    """BasicBlock.forward (eval-mode folded BN):
       out = relu(BN1(conv1_3x3_s(x))); out = BN2(conv2_3x3_1(out));
       out = relu(out + shortcut(x)), shortcut = 1x1 conv + BN or identity."""
    N, Cin, H, W = x_nchw.shape
    Cout = params["w1"].shape[-1]
    has_proj = params["ws"] is not None
    if not has_proj:
        # PyTorch BasicBlock only uses an identity shortcut when Cin == Cout;
        # with stride != 1 the residual add would be shape-mismatched, so fail
        # loudly instead of silently substituting a strided slice.
        assert stride == 1 and Cin == Cout, \
            "identity shortcut requires stride == 1 and Cin == Cout"

    # NCHW -> NHWC once, bf16 for MXU feeding (epilogues stay f32).
    x = jnp.transpose(x_nchw, (0, 2, 3, 1)).astype(jnp.bfloat16)

    # conv1 (3x3, stride, pad=1) with BN scale folded into the weights, ReLU.
    w1f = params["w1"].reshape(9 * Cin, Cout) * params["s1"][None, :]
    p1, Ho, Wo = _im2col(x, 3, stride, 1)
    out1 = _conv_matmul(p1, w1f, params["b1"], out_dtype=jnp.bfloat16)

    # conv2 (3x3, stride 1, pad=1) + fused shortcut + residual add + ReLU.
    w2f = params["w2"].reshape(9 * Cout, Cout) * params["s2"][None, :]
    p2, _, _ = _im2col(out1.reshape(N, Ho, Wo, Cout), 3, 1, 1)
    if has_proj:
        xs = x[:, ::stride, ::stride, :].reshape(N * Ho * Wo, Cin)
        wsf = params["ws"].reshape(Cin, Cout) * params["ss"][None, :]
        out2 = _conv_matmul(p2, w2f, params["b2"] + params["bs"],
                            shortcut=(xs, wsf), out_dtype=jnp.float32)
    else:
        out2 = _conv_matmul(p2, w2f, params["b2"],
                            residual=x.reshape(N * H * W, Cin),
                            out_dtype=jnp.float32)

    return jnp.transpose(out2.reshape(N, Ho, Wo, Cout), (0, 3, 1, 2))  # NCHW


# --------------------- deterministic parameter init ------------------------- #

def init_params(key, cin, cout):
    ks = jax.random.split(key, 16)
    eps = 1e-5

    def msra(k, shape, fan_in):
        return jax.random.normal(k, shape, jnp.float32) * jnp.sqrt(2.0 / fan_in)

    def bn(kg, kb, km, kv, c):  # eval-mode BN folded to (scale, bias)
        gamma = 1.0 + 0.1 * jax.random.normal(kg, (c,), jnp.float32)
        beta = 0.1 * jax.random.normal(kb, (c,), jnp.float32)
        mean = 0.1 * jax.random.normal(km, (c,), jnp.float32)
        var = jnp.abs(jax.random.normal(kv, (c,), jnp.float32)) + 0.5
        scale = gamma / jnp.sqrt(var + eps)
        return scale, beta - mean * scale

    params = {
        "w1": msra(ks[0], (3, 3, cin, cout), 9 * cin),
        "w2": msra(ks[1], (3, 3, cout, cout), 9 * cout),
    }
    params["s1"], params["b1"] = bn(ks[2], ks[3], ks[4], ks[5], cout)
    params["s2"], params["b2"] = bn(ks[6], ks[7], ks[8], ks[9], cout)
    if cin != cout:
        params["ws"] = msra(ks[10], (1, 1, cin, cout), cin)
        params["ss"], params["bs"] = bn(ks[11], ks[12], ks[13], ks[14], cout)
    else:
        params["ws"], params["ss"], params["bs"] = None, None, None
    return params


# ------------------------- pure-JAX reference -------------------------------- #
# Mirrors the kernel's numerics: BN scale folded into bf16 weights (exact f32
# fold, then bf16 operand rounding), f32 accumulation, f32 bias/ReLU epilogue,
# bf16 intermediate between conv1 and conv2.

def _fold(w, scale):
    return (w * scale.reshape((1,) * (w.ndim - 1) + (-1,))).astype(jnp.bfloat16)


def _ref_conv(x_nhwc, w_bf16, bias, stride, pad, relu):
    y = jax.lax.conv_general_dilated(
        x_nhwc.astype(jnp.bfloat16), w_bf16,
        (stride, stride), [(pad, pad), (pad, pad)],
        dimension_numbers=("NHWC", "HWIO", "NHWC"),
        preferred_element_type=jnp.float32)
    y = y + bias
    return jnp.maximum(y, 0.0) if relu else y


def ref_forward(x_nchw, params, stride):
    x = jnp.transpose(x_nchw, (0, 2, 3, 1)).astype(jnp.bfloat16)
    o = _ref_conv(x, _fold(params["w1"], params["s1"]), params["b1"],
                  stride, 1, True)
    o = o.astype(jnp.bfloat16)
    o = _ref_conv(o, _fold(params["w2"], params["s2"]), params["b2"],
                  1, 1, False)
    if params["ws"] is not None:
        sc = _ref_conv(x, _fold(params["ws"], params["ss"]), params["bs"],
                       stride, 0, False)
    else:
        sc = x.astype(jnp.float32)
    o = jnp.maximum(o + sc, 0.0)
    return jnp.transpose(o, (0, 3, 1, 2))


# ---------------------------------- main ------------------------------------- #

if __name__ == "__main__":
    key = jax.random.PRNGKey(0)
    kx, kp, kx2, kp2 = jax.random.split(key, 4)

    fwd = jax.jit(basic_block_forward, static_argnums=2)

    # Config 1: projection shortcut (Cin != Cout), stride-2 downsample.
    N, Cin, H, W = 2, 4, 16, 16
    Cout, stride = 8, 2
    x = jax.random.normal(kx, (N, Cin, H, W), jnp.float32)
    params = init_params(kp, Cin, Cout)

    out = jax.block_until_ready(fwd(x, params, stride))
    ref = jax.block_until_ready(ref_forward(x, params, stride))
    assert out.shape == (N, Cout, H // stride, W // stride), out.shape
    assert jnp.allclose(out, ref, atol=1e-2, rtol=1e-2), \
        float(jnp.max(jnp.abs(out - ref)))

    # Config 2: identity shortcut (Cin == Cout, stride 1).
    x2 = jax.random.normal(kx2, (N, 8, H, W), jnp.float32)
    params2 = init_params(kp2, 8, 8)
    out2 = jax.block_until_ready(fwd(x2, params2, 1))
    ref2 = jax.block_until_ready(ref_forward(x2, params2, 1))
    assert out2.shape == (N, 8, H, W), out2.shape
    assert jnp.allclose(out2, ref2, atol=1e-2, rtol=1e-2), \
        float(jnp.max(jnp.abs(out2 - ref2)))

    print("KERNEL_OK")
</pallas_src>

<mosaic_0001>
module attributes {stable_mosaic.version = 11 : i64} {
  func.func @_conv_bias_relu_kernel(%arg0: i32, %arg1: i32, %arg2: memref<64x128xbf16, #tpu.memory_space<vmem>>, %arg3: memref<128x128xbf16, #tpu.memory_space<vmem>>, %arg4: memref<1x128xf32, #tpu.memory_space<vmem>>, %arg5: memref<64x128xbf16, #tpu.memory_space<vmem>>) attributes {dimension_semantics = [#tpu.dimension_semantics<parallel>, #tpu.dimension_semantics<parallel>], iteration_bounds = array<i64: 1, 2>, scalar_prefetch = 0 : i64, scratch_operands = 0 : i64, tpu.core_type = #tpu.core_type<tc>, window_params = [{transform_indices = @transform_0, window_bounds = array<i64: 64, 128>}, {transform_indices = @transform_1, window_bounds = array<i64: 128, 128>}, {transform_indices = @transform_2, window_bounds = array<i64: 1, 128>}, {transform_indices = @transform_3, window_bounds = array<i64: 64, 128>}]} {
    %c0 = arith.constant 0 : index
    %c0_0 = arith.constant 0 : index
    %0 = vector.load %arg2[%c0, %c0_0] : memref<64x128xbf16, #tpu.memory_space<vmem>>, vector<64x128xbf16>
    %c0_1 = arith.constant 0 : index
    %c0_2 = arith.constant 0 : index
    %1 = vector.load %arg3[%c0_1, %c0_2] : memref<128x128xbf16, #tpu.memory_space<vmem>>, vector<128x128xbf16>
    %cst = arith.constant dense<0.000000e+00> : vector<64x128xf32>
    %2 = tpu.matmul %0, %1, %cst {dimension_numbers = #tpu.dot_dimension_numbers<[1], [0], [0], [1], [0, 0, 1, 1], [], []>} : vector<64x128xbf16>, vector<128x128xbf16>, vector<64x128xf32> -> vector<64x128xf32>
    %c0_3 = arith.constant 0 : index
    %c0_4 = arith.constant 0 : index
    %3 = vector.load %arg4[%c0_3, %c0_4] : memref<1x128xf32, #tpu.memory_space<vmem>>, vector<1x128xf32>
    %4 = vector.broadcast %3 : vector<1x128xf32> to vector<64x128xf32>
    %5 = arith.addf %2, %4 : vector<64x128xf32>
    %cst_5 = arith.constant 0.000000e+00 : f32
    %6 = vector.broadcast %cst_5 : f32 to vector<64x128xf32>
    %7 = arith.maximumf %5, %6 : vector<64x128xf32>
    %8 = arith.truncf %7 : vector<64x128xf32> to vector<64x128xbf16>
    %c0_6 = arith.constant 0 : index
    %c0_7 = arith.constant 0 : index
    %9 = vector.load %arg5[%c0_6, %c0_7] : memref<64x128xbf16, #tpu.memory_space<vmem>>, vector<64x128xbf16>
    tpu.vector_store %arg5[%c0_6, %c0_7], %8 {strides = array<i32>} : memref<64x128xbf16, #tpu.memory_space<vmem>>, vector<64x128xbf16>,
    return
  }
  func.func @transform_0(%arg0: i32, %arg1: i32) -> (i32, i32) {
    %c0_i32 = arith.constant 0 : i32
    %c0_i32_0 = arith.constant 0 : i32
    return %arg1, %c0_i32 : i32, i32
  }
  func.func @transform_1(%arg0: i32, %arg1: i32) -> (i32, i32) {
    %c0_i32 = arith.constant 0 : i32
    %c0_i32_0 = arith.constant 0 : i32
    return %c0_i32, %arg0 : i32, i32
  }
  func.func @transform_2(%arg0: i32, %arg1: i32) -> (i32, i32) {
    %c0_i32 = arith.constant 0 : i32
    %c0_i32_0 = arith.constant 0 : i32
    return %c0_i32, %arg0 : i32, i32
  }
  func.func @transform_3(%arg0: i32, %arg1: i32) -> (i32, i32) {
    %c0_i32 = arith.constant 0 : i32
    return %arg1, %arg0 : i32, i32
  }
}

module attributes {stable_mosaic.version = 11 : i64} {
  func.func @_conv_proj_bias_relu_kernel(%arg0: i32, %arg1: i32, %arg2: memref<64x128xbf16, #tpu.memory_space<vmem>>, %arg3: memref<128x128xbf16, #tpu.memory_space<vmem>>, %arg4: memref<1x128xf32, #tpu.memory_space<vmem>>, %arg5: memref<64x128xbf16, #tpu.memory_space<vmem>>, %arg6: memref<128x128xbf16, #tpu.memory_space<vmem>>, %arg7: memref<64x128xf32, #tpu.memory_space<vmem>>) attributes {dimension_semantics = [#tpu.dimension_semantics<parallel>, #tpu.dimension_semantics<parallel>], iteration_bounds = array<i64: 1, 2>, scalar_prefetch = 0 : i64, scratch_operands = 0 : i64, tpu.core_type = #tpu.core_type<tc>, window_params = [{transform_indices = @transform_0, window_bounds = array<i64: 64, 128>}, {transform_indices = @transform_1, window_bounds = array<i64: 128, 128>}, {transform_indices = @transform_2, window_bounds = array<i64: 1, 128>}, {transform_indices = @transform_3, window_bounds = array<i64: 64, 128>}, {transform_indices = @transform_4, window_bounds = array<i64: 128, 128>}, {transform_indices = @transform_5, window_bounds = array<i64: 64, 128>}]} {
    %c0 = arith.constant 0 : index
    %c0_0 = arith.constant 0 : index
    %0 = vector.load %arg2[%c0, %c0_0] : memref<64x128xbf16, #tpu.memory_space<vmem>>, vector<64x128xbf16>
    %c0_1 = arith.constant 0 : index
    %c0_2 = arith.constant 0 : index
    %1 = vector.load %arg3[%c0_1, %c0_2] : memref<128x128xbf16, #tpu.memory_space<vmem>>, vector<128x128xbf16>
    %cst = arith.constant dense<0.000000e+00> : vector<64x128xf32>
    %2 = tpu.matmul %0, %1, %cst {dimension_numbers = #tpu.dot_dimension_numbers<[1], [0], [0], [1], [0, 0, 1, 1], [], []>} : vector<64x128xbf16>, vector<128x128xbf16>, vector<64x128xf32> -> vector<64x128xf32>
    %c0_3 = arith.constant 0 : index
    %c0_4 = arith.constant 0 : index
    %3 = vector.load %arg5[%c0_3, %c0_4] : memref<64x128xbf16, #tpu.memory_space<vmem>>, vector<64x128xbf16>
    %c0_5 = arith.constant 0 : index
    %c0_6 = arith.constant 0 : index
    %4 = vector.load %arg6[%c0_5, %c0_6] : memref<128x128xbf16, #tpu.memory_space<vmem>>, vector<128x128xbf16>
    %cst_7 = arith.constant dense<0.000000e+00> : vector<64x128xf32>
    %5 = tpu.matmul %3, %4, %cst_7 {dimension_numbers = #tpu.dot_dimension_numbers<[1], [0], [0], [1], [0, 0, 1, 1], [], []>} : vector<64x128xbf16>, vector<128x128xbf16>, vector<64x128xf32> -> vector<64x128xf32>
    %6 = arith.addf %2, %5 : vector<64x128xf32>
    %c0_8 = arith.constant 0 : index
    %c0_9 = arith.constant 0 : index
    %7 = vector.load %arg4[%c0_8, %c0_9] : memref<1x128xf32, #tpu.memory_space<vmem>>, vector<1x128xf32>
    %8 = vector.broadcast %7 : vector<1x128xf32> to vector<64x128xf32>
    %9 = arith.addf %6, %8 : vector<64x128xf32>
    %cst_10 = arith.constant 0.000000e+00 : f32
    %10 = vector.broadcast %cst_10 : f32 to vector<64x128xf32>
    %11 = arith.maximumf %9, %10 : vector<64x128xf32>
    %c0_11 = arith.constant 0 : index
    %c0_12 = arith.constant 0 : index
    %12 = vector.load %arg7[%c0_11, %c0_12] : memref<64x128xf32, #tpu.memory_space<vmem>>, vector<64x128xf32>
    tpu.vector_store %arg7[%c0_11, %c0_12], %11 {strides = array<i32>} : memref<64x128xf32, #tpu.memory_space<vmem>>, vector<64x128xf32>,
    return
  }
  func.func @transform_0(%arg0: i32, %arg1: i32) -> (i32, i32) {
    %c0_i32 = arith.constant 0 : i32
    %c0_i32_0 = arith.constant 0 : i32
    return %arg1, %c0_i32 : i32, i32
  }
  func.func @transform_1(%arg0: i32, %arg1: i32) -> (i32, i32) {
    %c0_i32 = arith.constant 0 : i32
    %c0_i32_0 = arith.constant 0 : i32
    return %c0_i32, %arg0 : i32, i32
  }
  func.func @transform_2(%arg0: i32, %arg1: i32) -> (i32, i32) {
    %c0_i32 = arith.constant 0 : i32
    %c0_i32_0 = arith.constant 0 : i32
    return %c0_i32, %arg0 : i32, i32
  }
  func.func @transform_3(%arg0: i32, %arg1: i32) -> (i32, i32) {
    %c0_i32 = arith.constant 0 : i32
    %c0_i32_0 = arith.constant 0 : i32
    return %arg1, %c0_i32 : i32, i32
  }
  func.func @transform_4(%arg0: i32, %arg1: i32) -> (i32, i32) {
    %c0_i32 = arith.constant 0 : i32
    %c0_i32_0 = arith.constant 0 : i32
    return %c0_i32, %arg0 : i32, i32
  }
  func.func @transform_5(%arg0: i32, %arg1: i32) -> (i32, i32) {
    %c0_i32 = arith.constant 0 : i32
    return %arg1, %arg0 : i32, i32
  }
}

</mosaic_0001>

<bundles_post_ra>
// kernel: basic_block_forward.2
= control target key start
LH: loop header
LB: loop body
LE: loop exit
PB: predicated region body
PF: predicated region fallthrough
CT: control target
= control target key end

     0   :  { %s741_s12 = smov 0   ;;  %s743_s13 = smov 0   ;;  %s814_s0 = inlined_call_operand.vmem [shape: bf16[128,128], index: 0, kind: input, shape index: {}]   ;;  %s815_s1 = inlined_call_operand.vmem [shape: bf16[128,128], index: 1, kind: input, shape index: {}]   ;;  %s816_s2 = inlined_call_operand.vmem [shape: f32[1,128], index: 2, kind: input, shape index: {}]   ;;  %s817_s3 = inlined_call_operand.vmem [shape: bf16[128,128], index: 3, kind: output, shape index: {}]  }
   0x1   :  { %s745_s14 = smov 0  }
   0x2 LB: > { %s22_s15 = sadd.s32 1, %s715_s13  ;;  %p550_p0 = scmp.ge.s32.totalorder %s719_s14, 1  ;;  %s719_s14 = sphi %s745_s14, %s13_s14   ;;  %s715_s13 = sphi %s743_s13, %s819_s13   ;;  %s711_s12 = sphi %s741_s12, %s818_s12  }
   0x3   : > { %p23_p1 = scmp.ge.s32.totalorder %s22_s15, 2  ;;  %p169_p2 = scmp.lt.s32.totalorder %s719_s14, 3 }
   0x5   : > { %s821_s15 = smov (%p23_p1, %s22_s15), 0  ;;  %p170_p3 = pnand %p550_p0, %p169_p2 }
   0x6   : > { %v685_v0 = vld [vmem:[%s815_s1] sm:$0xff] (!%p170_p3)   ;;  %s551_s18 = sshll.u32 (!%p170_p3), %s711_s12, 3  ;;  %v686_v1 = vld [vmem:[%s815_s1 + $0x8] sm:$0xff] (!%p170_p3)   ;;  %v687_v2 = vld [vmem:[%s815_s1 + $0x10] sm:$0xff] (!%p170_p3)  }
   0x7   : > { %173 = sbr.rel (%p170_p3) target bundleno = 261 (0x105), region = 32  ;;  %p204_p4 = scmp.lt.s32.totalorder (!%p170_p3), %s551_s18, 15  ;;  %621 = vmatprep.subr.bf16.mxu0 (!%p170_p3), %v685_v0  ;;  %645 = vmatprep.subr.bf16.mxu1 (!%p170_p3), %v685_v0  ;;  %v688_v3 = vld [vmem:[%s815_s1 + $0x18] sm:$0xff] (!%p170_p3)   ;;  %v689_v6 = vld [vmem:[%s815_s1 + $0x20] sm:$0xff] (!%p170_p3)   ;;  %v690_v7 = vld [vmem:[%s815_s1 + $0x28] sm:$0xff] (!%p170_p3)  }
   0x8   : > { %622 = vmatpush3.bf16.msra.mxu0 (!%p170_p3), %v685_v0  ;;  %653 = vmatpush3.bf16.msra.mxu1 (!%p170_p3), %v685_v0  ;;  %v691_v8 = vld [vmem:[%s815_s1 + $0x30] sm:$0xff] (!%p170_p3)   ;;  %v692_v9 = vld [vmem:[%s815_s1 + $0x38] sm:$0xff] (!%p170_p3)   ;;  %v555_v12 = vld [vmem:[%s816_s2] ss:$0 sm:$0xff] (!%p170_p3) }
   0x9   : > { %623 = vmatprep.subr.bf16.mxu0 (!%p170_p3), %v686_v1  ;;  %646 = vmatprep.subr.bf16.mxu1 (!%p170_p3), %v686_v1 }
   0xc   : > { %624 = vmatpush3.bf16.msra.mxu0 (!%p170_p3), %v686_v1  ;;  %654 = vmatpush3.bf16.msra.mxu1 (!%p170_p3), %v686_v1 }
   0xd   : > { %625 = vmatprep.subr.bf16.mxu0 (!%p170_p3), %v687_v2  ;;  %647 = vmatprep.subr.bf16.mxu1 (!%p170_p3), %v687_v2 }
   0xe   : > { %s823_s18 = smov (!%p204_p4, %s551_s18), 15 }
   0xf   : > { %s552_s23 = sshll.u32 %s823_s18, 2 }
  0x10   : > { %s776_s26 = scalar_lea.vmem %s814_s0, %s552_s23  ;;  %626 = vmatpush3.bf16.msra.mxu0 %v687_v2  ;;  %655 = vmatpush3.bf16.msra.mxu1 %v687_v2  ;;  %s223_s17 = scalar_lea.vmem %s817_s3, %s552_s23 }
  0x11   : > { %v693_v4 = vld [vmem:[%s776_s26] sm:$0xff]   ;;  %v694_v5 = vld [vmem:[%s776_s26 + $0x10] sm:$0xff]   ;;  %627 = vmatprep.subr.bf16.mxu0 %v688_v3  ;;  %648 = vmatprep.subr.bf16.mxu1 %v688_v3  ;;  %v695_v10 = vld [vmem:[%s776_s26 + $0x8] sm:$0xff]  }
  0x12   : > { %637 = vmatprep.mubr.bf16.mxu0 %v693_v4  ;;  %641 = vmatprep.mubr.bf16.mxu1 %v694_v5  ;;  %v696_v11 = vld [vmem:[%s776_s26 + $0x18] sm:$0xff]  }
  0x14   : > { %628 = vmatpush3.bf16.msra.mxu0 %v688_v3  ;;  %656 = vmatpush3.bf16.msra.mxu1 %v688_v3 }
  0x15   : > { %629 = vmatprep.subr.bf16.mxu0 %v689_v6  ;;  %649 = vmatprep.subr.bf16.mxu1 %v689_v6 }
  0x18   : > { %630 = vmatpush3.bf16.msra.mxu0 %v689_v6  ;;  %657 = vmatpush3.bf16.msra.mxu1 %v689_v6 }
  0x19   : > { %631 = vmatprep.subr.bf16.mxu0 %v690_v7  ;;  %650 = vmatprep.subr.bf16.mxu1 %v690_v7 }
  0x1c   : > { %632 = vmatpush3.bf16.msra.mxu0 %v690_v7  ;;  %658 = vmatpush3.bf16.msra.mxu1 %v690_v7 }
  0x1d   : > { %633 = vmatprep.subr.bf16.mxu0 %v691_v8  ;;  %651 = vmatprep.subr.bf16.mxu1 %v691_v8 }
  0x20   : > { %634 = vmatpush3.bf16.msra.mxu0 %v691_v8  ;;  %659 = vmatpush3.bf16.msra.mxu1 %v691_v8 }
  0x21   : > { %635 = vmatprep.subr.bf16.mxu0 %v692_v9  ;;  %652 = vmatprep.subr.bf16.mxu1 %v692_v9 }
  0x24   : > { %636 = vmatpush3.bf16.msra.mxu0 %v692_v9  ;;  %660 = vmatpush3.bf16.msra.mxu1 %v692_v9 }
  0x27   : > { %638 = vmatmul.mubr.bf16.vlgmr.msra.gmra.mrb[0].mxu0 %v695_v10  ;;  %642 = vmatmul.mubr.bf16.vlgmr.msra.gmra.mrb[0].mxu1 %v696_v11 }
  0xfa   : > { %v639_v13 = vpop.f32.mrb[0].mxu0  ;;  %v643_v14 = vpop.f32.mrb[0].mxu1 }
  0xfb   : > { %v372_v15 = vadd.f32 %v639_v13, %v555_v12  ;;  %v388_v16 = vadd.f32 %v643_v14, %v555_v12  ;;  %v363_v17 = vpop.f32.mrb[1].mxu0  ;;  %v379_v18 = vpop.f32.mrb[1].mxu1 }
  0xfc   : > { %v364_v19 = vadd.f32 %v555_v12, %v363_v17  ;;  %v380_v20 = vadd.f32 %v555_v12, %v379_v18  ;;  %v640_v21 = vpop.f32.mrb[2].mxu0  ;;  %v644_v22 = vpop.f32.mrb[2].mxu1 }
  0xfd   : > { %v375_v23 = vadd.f32 %v640_v21, %v555_v12  ;;  %v391_v24 = vadd.f32 %v644_v22, %v555_v12  ;;  %v366_v25 = vpop.f32.mrb[3].mxu0  ;;  %v382_v26 = vpop.f32.mrb[3].mxu1  ;;  %v396_v29 = vmax.f32 %v372_v15, 0.0  ;;  %v400_v30 = vmax.f32 %v388_v16, 0.0 }
  0xfe   : > { %v367_v27 = vadd.f32 %v555_v12, %v366_v25  ;;  %v383_v28 = vadd.f32 %v555_v12, %v382_v26  ;;  %v394_v33 = vmax.f32 %v364_v19, 0.0  ;;  %v398_v34 = vmax.f32 %v380_v20, 0.0 }
  0xff   : > { %v397_v31 = vmax.f32 %v375_v23, 0.0  ;;  %v401_v32 = vmax.f32 %v391_v24, 0.0 }
 0x100   : > { %v395_v35 = vmax.f32 %v367_v27, 0.0  ;;  %v399_v36 = vmax.f32 %v383_v28, 0.0 }
 0x101   : > { %v594_v37 = vpack.c.bf16 %v397_v31, %v396_v29  ;;  %v604_v38 = vpack.c.bf16 %v401_v32, %v400_v30 }
 0x102   : > { %v589_v39 = vpack.c.bf16 %v395_v35, %v394_v33  ;;  %v599_v40 = vpack.c.bf16 %v399_v36, %v398_v34 }
 0x103   : > { %606 = vst [vmem:[%s223_s17 + $0x8] sm:$0xff] %v594_v37   ;;  %608 = vst [vmem:[%s223_s17 + $0x18] sm:$0xff] %v604_v38  }
 0x104   : > { %590 = vst [vmem:[%s223_s17] sm:$0xff] %v589_v39   ;;  %607 = vst [vmem:[%s223_s17 + $0x10] sm:$0xff] %v599_v40  }
 0x105 PF: > { %s13_s14 = sadd.s32 1, %s719_s14   ;;  %s818_s12 = smov %s715_s13 }
 0x106   : > { %p10_p5 = scmp.ge.s32.totalorder %s13_s14, 4   ;;  %s819_s13 = smov %s821_s15 }
 0x108   :  { %12 = sbr.rel (!%p10_p5) target bundleno = 2 (0x2), region = 68 }

// kernel: basic_block_forward.3
= control target key start
LH: loop header
LB: loop body
LE: loop exit
PB: predicated region body
PF: predicated region fallthrough
CT: control target
= control target key end

     0   :  { %s1024_s18 = smov 0   ;;  %s1026_s19 = smov 0   ;;  %s1137_s0 = inlined_call_operand.vmem [shape: bf16[128,128], index: 0, kind: input, shape index: {}]   ;;  %s1138_s1 = inlined_call_operand.vmem [shape: bf16[128,128], index: 1, kind: input, shape index: {}]   ;;  %s1139_s2 = inlined_call_operand.vmem [shape: f32[1,128], index: 2, kind: input, shape index: {}]   ;;  %s1140_s3 = inlined_call_operand.vmem [shape: bf16[128,128], index: 3, kind: input, shape index: {}]   ;;  %s1141_s4 = inlined_call_operand.vmem [shape: bf16[128,128], index: 4, kind: input, shape index: {}]   ;;  %s1142_s5 = inlined_call_operand.vmem [shape: f32[128,128], index: 5, kind: output, shape index: {}]  }
   0x1   :  { %s1028_s20 = smov 0  }
   0x2 LB: > { %s24_s21 = sadd.s32 1, %s988_s19  ;;  %p808_p0 = scmp.ge.s32.totalorder %s992_s20, 1  ;;  %s992_s20 = sphi %s1028_s20, %s15_s20   ;;  %s988_s19 = sphi %s1026_s19, %s1144_s19   ;;  %s984_s18 = sphi %s1024_s18, %s1143_s18  }
   0x3   : > { %p25_p1 = scmp.ge.s32.totalorder %s24_s21, 2  ;;  %p239_p2 = scmp.lt.s32.totalorder %s992_s20, 3 }
   0x5   : > { %s1146_s21 = smov (%p25_p1, %s24_s21), 0  ;;  %p240_p3 = pnand %p808_p0, %p239_p2 }
   0x6   : > { %v946_v0 = vld [vmem:[%s1141_s4] sm:$0xff] (!%p240_p3)   ;;  %s809_s24 = sshll.u32 (!%p240_p3), %s984_s18, 3  ;;  %v948_v2 = vld [vmem:[%s1141_s4 + $0x8] sm:$0xff] (!%p240_p3)   ;;  %v950_v4 = vld [vmem:[%s1141_s4 + $0x10] sm:$0xff] (!%p240_p3)  }
   0x7   : > { %243 = sbr.rel (%p240_p3) target bundleno = 270 (0x10e), region = 40  ;;  %v947_v1 = vld [vmem:[%s1138_s1] sm:$0xff] (!%p240_p3)   ;;  %866 = vmatprep.subr.bf16.mxu1 (!%p240_p3), %v946_v0  ;;  %p287_p4 = scmp.lt.s32.totalorder (!%p240_p3), %s809_s24, 15  ;;  %v949_v3 = vld [vmem:[%s1138_s1 + $0x8] sm:$0xff] (!%p240_p3)   ;;  %v951_v5 = vld [vmem:[%s1138_s1 + $0x10] sm:$0xff] (!%p240_p3)  }
   0x8   : > { %890 = vmatprep.subr.bf16.mxu0 (!%p240_p3), %v947_v1  ;;  %867 = vmatpush3.bf16.msra.mxu1 (!%p240_p3), %v946_v0  ;;  %v952_v6 = vld [vmem:[%s1141_s4 + $0x18] sm:$0xff] (!%p240_p3)   ;;  %v954_v8 = vld [vmem:[%s1141_s4 + $0x20] sm:$0xff] (!%p240_p3)   ;;  %v956_v10 = vld [vmem:[%s1141_s4 + $0x28] sm:$0xff] (!%p240_p3)  }
   0x9   : > { %891 = vmatpush3.bf16.msra.mxu0 (!%p240_p3), %v947_v1  ;;  %868 = vmatprep.subr.bf16.mxu1 (!%p240_p3), %v948_v2  ;;  %v953_v7 = vld [vmem:[%s1138_s1 + $0x18] sm:$0xff] (!%p240_p3)   ;;  %v955_v9 = vld [vmem:[%s1138_s1 + $0x20] sm:$0xff] (!%p240_p3)   ;;  %v957_v11 = vld [vmem:[%s1138_s1 + $0x28] sm:$0xff] (!%p240_p3)  }
   0xa   : > { %892 = vmatprep.subr.bf16.mxu0 (!%p240_p3), %v949_v3  ;;  %v958_v14 = vld [vmem:[%s1141_s4 + $0x30] sm:$0xff] (!%p240_p3)   ;;  %v960_v16 = vld [vmem:[%s1141_s4 + $0x38] sm:$0xff] (!%p240_p3)   ;;  %v839_v26 = vld [vmem:[%s1139_s2] ss:$0 sm:$0xff] (!%p240_p3) }
   0xb   : > { %v959_v15 = vld [vmem:[%s1138_s1 + $0x30] sm:$0xff] (!%p240_p3)   ;;  %v961_v17 = vld [vmem:[%s1138_s1 + $0x38] sm:$0xff] (!%p240_p3)  }
   0xc   : > { %869 = vmatpush3.bf16.msra.mxu1 (!%p240_p3), %v948_v2 }
   0xd   : > { %893 = vmatpush3.bf16.msra.mxu0 (!%p240_p3), %v949_v3  ;;  %870 = vmatprep.subr.bf16.mxu1 (!%p240_p3), %v950_v4 }
   0xe   : > { %s1148_s24 = smov (!%p287_p4, %s809_s24), 15  ;;  %894 = vmatprep.subr.bf16.mxu0 %v951_v5 }
   0xf   : > { %s810_s14 = sshll.u32 %s1148_s24, 2  ;;  %s814_s18 = sshll.u32 %s1148_s24, 3 }
  0x10   : > { %871 = vmatpush3.bf16.msra.mxu1 %v950_v4  ;;  %s1078_s25 = scalar_lea.vmem %s1140_s3, %s810_s14  ;;  %s1086_s30 = scalar_lea.vmem %s1137_s0, %s810_s14 }
  0x11   : > { %895 = vmatpush3.bf16.msra.mxu0 %v951_v5  ;;  %872 = vmatprep.subr.bf16.mxu1 %v952_v6  ;;  %v962_v12 = vld [vmem:[%s1078_s25] sm:$0xff]   ;;  %v964_v18 = vld [vmem:[%s1078_s25 + $0x8] sm:$0xff]   ;;  %v966_v20 = vld [vmem:[%s1078_s25 + $0x10] sm:$0xff]  }
  0x12   : > { %896 = vmatprep.subr.bf16.mxu0 %v953_v7  ;;  %v963_v13 = vld [vmem:[%s1086_s30] sm:$0xff]   ;;  %882 = vmatprep.mubr.bf16.mxu1 %v962_v12  ;;  %v965_v19 = vld [vmem:[%s1086_s30 + $0x8] sm:$0xff]   ;;  %v967_v21 = vld [vmem:[%s1086_s30 + $0x10] sm:$0xff]  }
  0x13   : > { %906 = vmatprep.mubr.bf16.mxu0 %v963_v13  ;;  %v968_v22 = vld [vmem:[%s1078_s25 + $0x18] sm:$0xff]   ;;  %s1118_s25 = scalar_lea.vmem %s1142_s5, %s814_s18 }
  0x14   : > { %873 = vmatpush3.bf16.msra.mxu1 %v952_v6  ;;  %v969_v23 = vld [vmem:[%s1086_s30 + $0x18] sm:$0xff]  }
  0x15   : > { %897 = vmatpush3.bf16.msra.mxu0 %v953_v7  ;;  %874 = vmatprep.subr.bf16.mxu1 %v954_v8 }
  0x16   : > { %898 = vmatprep.subr.bf16.mxu0 %v955_v9 }
  0x18   : > { %875 = vmatpush3.bf16.msra.mxu1 %v954_v8 }
  0x19   : > { %899 = vmatpush3.bf16.msra.mxu0 %v955_v9  ;;  %876 = vmatprep.subr.bf16.mxu1 %v956_v10 }
  0x1a   : > { %900 = vmatprep.subr.bf16.mxu0 %v957_v11 }
  0x1c   : > { %877 = vmatpush3.bf16.msra.mxu1 %v956_v10 }
  0x1d   : > { %901 = vmatpush3.bf16.msra.mxu0 %v957_v11  ;;  %878 = vmatprep.subr.bf16.mxu1 %v958_v14 }
  0x1e   : > { %902 = vmatprep.subr.bf16.mxu0 %v959_v15 }
  0x20   : > { %879 = vmatpush3.bf16.msra.mxu1 %v958_v14 }
  0x21   : > { %903 = vmatpush3.bf16.msra.mxu0 %v959_v15  ;;  %880 = vmatprep.subr.bf16.mxu1 %v960_v16 }
  0x22   : > { %904 = vmatprep.subr.bf16.mxu0 %v961_v17 }
  0x24   : > { %881 = vmatpush3.bf16.msra.mxu1 %v960_v16 }
  0x25   : > { %905 = vmatpush3.bf16.msra.mxu0 %v961_v17 }
  0x27   : > { %883 = vmatmul.mubr.bf16.vlgmr.msra.gmra.mrb[0].mxu1 %v964_v18 }
  0x28   : > { %907 = vmatmul.mubr.bf16.vlgmr.msra.gmra.mrb[0].mxu0 %v965_v19  ;;  %886 = vmatprep.mubr.bf16.mxu1 %v966_v20 }
  0x29   : > { %910 = vmatprep.mubr.bf16.mxu0 %v967_v21 }
  0x2f   : > { %887 = vmatmul.mubr.bf16.gmra.mrb[4].mxu1 %v968_v22 }
  0x30   : > { %911 = vmatmul.mubr.bf16.gmra.mrb[4].mxu0 %v969_v23 }
  0xfa   : > { %v884_v24 = vpop.f32.mrb[0].mxu1 }
  0xfb   : > { %v908_v25 = vpop.f32.mrb[0].mxu0  ;;  %v473_v27 = vpop.f32.mrb[1].mxu1 }
  0xfc   : > { %v619_v28 = vadd.f32 %v908_v25, %v884_v24  ;;  %v610_v29 = vpop.f32.mrb[1].mxu0  ;;  %v885_v30 = vpop.f32.mrb[2].mxu1 }
  0xfd   : > { %v611_v31 = vadd.f32 %v610_v29, %v473_v27  ;;  %v909_v32 = vpop.f32.mrb[2].mxu0  ;;  %v476_v33 = vpop.f32.mrb[3].mxu1 }
  0xfe   : > { %v650_v34 = vadd.f32 %v839_v26, %v619_v28  ;;  %v622_v35 = vadd.f32 %v909_v32, %v885_v30  ;;  %v613_v36 = vpop.f32.mrb[3].mxu0 }
  0xff   : > { %v648_v37 = vadd.f32 %v839_v26, %v611_v31  ;;  %v614_v38 = vadd.f32 %v613_v36, %v476_v33 }
 0x100   : > { %v658_v39 = vmax.f32 %v650_v34, 0.0  ;;  %v651_v40 = vadd.f32 %v839_v26, %v622_v35 }
 0x101   : > { %v656_v41 = vmax.f32 %v648_v37, 0.0  ;;  %v649_v42 = vadd.f32 %v839_v26, %v614_v38 }
 0x102   : > { %666 = vst [vmem:[%s1118_s25 + $0x10] sm:$0xff] %v658_v39  ;;  %v659_v43 = vmax.f32 %v651_v40, 0.0  ;;  %v888_v44 = vpop.f32.mrb[4].mxu1 }
 0x103   : > { %664 = vst [vmem:[%s1118_s25] sm:$0xff] %v656_v41  ;;  %v657_v45 = vmax.f32 %v649_v42, 0.0  ;;  %v912_v46 = vpop.f32.mrb[4].mxu0  ;;  %v489_v47 = vpop.f32.mrb[5].mxu1 }
 0x104   : > { %667 = vst [vmem:[%s1118_s25 + $0x18] sm:$0xff] %v659_v43  ;;  %v635_v48 = vadd.f32 %v912_v46, %v888_v44  ;;  %v626_v49 = vpop.f32.mrb[5].mxu0  ;;  %v889_v50 = vpop.f32.mrb[6].mxu1 }
 0x105   : > { %665 = vst [vmem:[%s1118_s25 + $0x8] sm:$0xff] %v657_v45  ;;  %v627_v51 = vadd.f32 %v626_v49, %v489_v47  ;;  %v913_v52 = vpop.f32.mrb[6].mxu0  ;;  %v492_v53 = vpop.f32.mrb[7].mxu1 }
 0x106   : > { %v654_v54 = vadd.f32 %v839_v26, %v635_v48  ;;  %v638_v55 = vadd.f32 %v913_v52, %v889_v50  ;;  %v629_v56 = vpop.f32.mrb[7].mxu0 }
 0x107   : > { %v652_v57 = vadd.f32 %v839_v26, %v627_v51  ;;  %v630_v58 = vadd.f32 %v629_v56, %v492_v53 }
 0x108   : > { %v662_v59 = vmax.f32 %v654_v54, 0.0  ;;  %v655_v60 = vadd.f32 %v839_v26, %v638_v55 }
 0x109   : > { %v660_v61 = vmax.f32 %v652_v57, 0.0  ;;  %v653_v62 = vadd.f32 %v839_v26, %v630_v58 }
 0x10a   : > { %670 = vst [vmem:[%s1118_s25 + $0x30] sm:$0xff] %v662_v59  ;;  %v663_v63 = vmax.f32 %v655_v60, 0.0 }
 0x10b   : > { %668 = vst [vmem:[%s1118_s25 + $0x20] sm:$0xff] %v660_v61  ;;  %v661_v0 = vmax.f32 %v653_v62, 0.0 }
 0x10c   : > { %671 = vst [vmem:[%s1118_s25 + $0x38] sm:$0xff] %v663_v63 }
 0x10d   : > { %669 = vst [vmem:[%s1118_s25 + $0x28] sm:$0xff] %v661_v0 }
 0x10e PF: > { %s15_s20 = sadd.s32 1, %s992_s20   ;;  %s1143_s18 = smov %s988_s19 }
 0x10f   : > { %p12_p5 = scmp.ge.s32.totalorder %s15_s20, 4   ;;  %s1144_s19 = smov %s1146_s21 }
 0x111   :  { %14 = sbr.rel (!%p12_p5) target bundleno = 2 (0x2), region = 82 }

</bundles_post_ra>
